<compile_context>
chip_gen: v5e
topology: v5e:2x2
jax: 0.10.0
libtpu: 0.0.40
codegen_flags: <defaults>
</compile_context>

<pallas_src>
import math

import jax
import jax.numpy as jnp
from jax.experimental import pallas as pl
from jax.experimental.pallas import tpu as pltpu

VECSIZE = 128   # hidden width (self.vecsize)
INFOSIZE = 8    # input features (self.infosize)
OUT_PAD = 128   # lane-dense padded width of the last layer (VMEM-only)


def _round_up(x, m):
    return ((x + m - 1) // m) * m


def _pick_tile_b(batch):
    """Adaptive batch tile.

    small  : one tile covering the (8-aligned) batch -> ~zero padded-row waste.
    medium : ~2 tiles so the "parallel" axis shards over v7x's two TensorCores.
    large  : 1024-row tiles (step overhead amortized; n_tiles >= 2 kept).
    """
    b8 = _round_up(batch, 8)
    if b8 <= 512:
        return b8
    if b8 <= 2048:
        return _round_up(pl.cdiv(b8, 2), 128)
    return 1024


# --------------------------------------------------------------------------
# Pallas kernel: one batch tile of the 3-layer MLP forward.
#   x      : (TILE_B, INFOSIZE)  f32   (cast to bf16 in-kernel)
#   W1     : (INFOSIZE, VECSIZE) bf16     b1    : (1, VECSIZE) f32
#   W2     : (VECSIZE, VECSIZE)  bf16     b2    : (1, VECSIZE) f32
#   W3pad  : (VECSIZE, OUT_PAD)  bf16     b3pad : (1, OUT_PAD) f32
#   out    : (TILE_B, num_actions) f32   (narrow store; padded compute in VMEM)
# --------------------------------------------------------------------------
def stocknet_kernel(x_ref, w1_ref, b1_ref, w2_ref, b2_ref, w3_ref, b3_ref, o_ref):
    x = x_ref[...].astype(jnp.bfloat16)   # in-kernel cast, hidden under matmuls

    h1 = jnp.dot(x, w1_ref[...], preferred_element_type=jnp.float32) + b1_ref[...]
    h1 = jnp.maximum(h1, 0.0).astype(jnp.bfloat16)

    h2 = jnp.dot(h1, w2_ref[...], preferred_element_type=jnp.float32) + b2_ref[...]
    h2 = jnp.maximum(h2, 0.0).astype(jnp.bfloat16)

    out = jnp.dot(h2, w3_ref[...], preferred_element_type=jnp.float32) + b3_ref[...]

    # 128-wide padded compute stays in VMEM; only real action columns hit HBM.
    num_actions = o_ref.shape[1]
    o_ref[...] = out[:, :num_actions].astype(o_ref.dtype)


# --------------------------------------------------------------------------
# One-time parameter packing (call once, reuse every rollout step).
# --------------------------------------------------------------------------
def prepare_params(params):
    num_actions = params["W3"].shape[1]
    w3 = jnp.zeros((VECSIZE, OUT_PAD), jnp.bfloat16).at[:, :num_actions].set(
        params["W3"].astype(jnp.bfloat16))
    b3 = jnp.zeros((1, OUT_PAD), jnp.float32).at[:, :num_actions].set(
        params["b3"].astype(jnp.float32))
    return {
        "W1": params["W1"].astype(jnp.bfloat16),
        "b1": params["b1"].astype(jnp.float32).reshape(1, VECSIZE),
        "W2": params["W2"].astype(jnp.bfloat16),
        "b2": params["b2"].astype(jnp.float32).reshape(1, VECSIZE),
        "W3pad": w3,
        "b3pad": b3,
        "num_actions": num_actions,   # static python int
    }


def stocknet_forward(info, packed, *, tile_b=None):
    """info: (B, INFOSIZE) float32.  packed: output of prepare_params().

    Returns (B, num_actions) float32.
    """
    B = info.shape[0]
    num_actions = packed["num_actions"]

    if tile_b is None:
        tile_b = _pick_tile_b(B)
    n_tiles = pl.cdiv(B, tile_b)
    b_pad = n_tiles * tile_b

    x = info.astype(jnp.float32)
    if b_pad != B:
        x = jnp.pad(x, ((0, b_pad - B), (0, 0)))

    flops = 2 * b_pad * (INFOSIZE * VECSIZE + VECSIZE * VECSIZE + VECSIZE * OUT_PAD)
    bytes_accessed = (
        b_pad * INFOSIZE * 4                                                  # f32 input
        + (packed["W1"].size + packed["W2"].size + packed["W3pad"].size) * 2  # bf16 weights
        + (packed["b1"].size + packed["b2"].size + packed["b3pad"].size) * 4  # f32 biases
        + b_pad * num_actions * 4                                             # f32 output
    )

    resident = lambda shape: pl.BlockSpec(shape, lambda i: (0, 0))

    out = pl.pallas_call(
        stocknet_kernel,
        out_shape=jax.ShapeDtypeStruct((b_pad, num_actions), jnp.float32),
        grid=(n_tiles,),
        in_specs=[
            pl.BlockSpec((tile_b, INFOSIZE), lambda i: (i, 0)),   # activations: tiled
            resident((INFOSIZE, VECSIZE)),                        # W1 (VMEM-resident)
            resident((1, VECSIZE)),                               # b1
            resident((VECSIZE, VECSIZE)),                         # W2
            resident((1, VECSIZE)),                               # b2
            resident((VECSIZE, OUT_PAD)),                         # W3 (padded)
            resident((1, OUT_PAD)),                               # b3 (padded)
        ],
        out_specs=pl.BlockSpec((tile_b, num_actions), lambda i: (i, 0)),
        compiler_params=pltpu.CompilerParams(
            dimension_semantics=("parallel",)),
        cost_estimate=pl.CostEstimate(
            flops=flops, transcendentals=0, bytes_accessed=bytes_accessed),
    )(x, packed["W1"], packed["b1"], packed["W2"], packed["b2"],
      packed["W3pad"], packed["b3pad"])

    return out[:B]


# --------------------------------------------------------------------------
# Deterministic parameter init (matches StockNet.__init__ semantics):
#   Linear weights: kaiming_normal_ (fan_in, gain=sqrt(2)) -> std = sqrt(2/fan_in)
#   Linear biases : 0
# Weights stored as (in_features, out_features) so the kernel does x @ W + b.
# --------------------------------------------------------------------------
def init_params(key, infosize, hidden, num_actions):
    k1, k2, k3 = jax.random.split(key, 3)

    def kaiming(k, fan_in, fan_out):
        std = math.sqrt(2.0 / fan_in)
        return jax.random.normal(k, (fan_in, fan_out), dtype=jnp.float32) * std

    return {
        "W1": kaiming(k1, infosize, hidden),
        "b1": jnp.zeros((1, hidden), dtype=jnp.float32),
        "W2": kaiming(k2, hidden, hidden),
        "b2": jnp.zeros((1, hidden), dtype=jnp.float32),
        "W3": kaiming(k3, hidden, num_actions),
        "b3": jnp.zeros((1, num_actions), dtype=jnp.float32),
    }


if __name__ == "__main__":
    NUM_ACTIONS = 4
    BATCH = 2

    key = jax.random.PRNGKey(0)
    k_params, k_input = jax.random.split(key)

    raw_params = init_params(k_params, INFOSIZE, VECSIZE, NUM_ACTIONS)
    packed = prepare_params(raw_params)          # one-time packing
    info = jax.random.normal(k_input, (BATCH, INFOSIZE), dtype=jnp.float32)

    out = stocknet_forward(info, packed)
    out = jax.block_until_ready(out)

    # Pure-JAX reference with the same bf16-weight / f32-accumulate math.
    xb = info.astype(jnp.bfloat16)
    w1b = raw_params["W1"].astype(jnp.bfloat16)
    w2b = raw_params["W2"].astype(jnp.bfloat16)
    w3b = raw_params["W3"].astype(jnp.bfloat16)
    h1 = jnp.maximum(
        jnp.dot(xb, w1b, preferred_element_type=jnp.float32) + raw_params["b1"], 0.0
    ).astype(jnp.bfloat16)
    h2 = jnp.maximum(
        jnp.dot(h1, w2b, preferred_element_type=jnp.float32) + raw_params["b2"], 0.0
    ).astype(jnp.bfloat16)
    ref = jnp.dot(h2, w3b, preferred_element_type=jnp.float32) + raw_params["b3"]

    assert out.shape == (BATCH, NUM_ACTIONS)
    assert jnp.allclose(out, ref, atol=1e-2, rtol=1e-2), (out, ref)

    print("KERNEL_OK")
</pallas_src>

<mosaic_0001>
module attributes {stable_mosaic.version = 11 : i64} {
  func.func @stocknet_kernel(%arg0: i32, %arg1: memref<8x8xf32, #tpu.memory_space<vmem>>, %arg2: memref<8x128xbf16, #tpu.memory_space<vmem>>, %arg3: memref<1x128xf32, #tpu.memory_space<vmem>>, %arg4: memref<128x128xbf16, #tpu.memory_space<vmem>>, %arg5: memref<1x128xf32, #tpu.memory_space<vmem>>, %arg6: memref<128x128xbf16, #tpu.memory_space<vmem>>, %arg7: memref<1x128xf32, #tpu.memory_space<vmem>>, %arg8: memref<8x4xf32, #tpu.memory_space<vmem>>) attributes {dimension_semantics = [#tpu.dimension_semantics<parallel>], iteration_bounds = array<i64: 1>, scalar_prefetch = 0 : i64, scratch_operands = 0 : i64, tpu.core_type = #tpu.core_type<tc>, window_params = [{transform_indices = @transform_0, window_bounds = array<i64: 8, 8>}, {pipeline_mode = #tpu.pipeline_mode<synchronous>, transform_indices = @transform_1, window_bounds = array<i64: 8, 128>}, {pipeline_mode = #tpu.pipeline_mode<synchronous>, transform_indices = @transform_2, window_bounds = array<i64: 1, 128>}, {pipeline_mode = #tpu.pipeline_mode<synchronous>, transform_indices = @transform_3, window_bounds = array<i64: 128, 128>}, {pipeline_mode = #tpu.pipeline_mode<synchronous>, transform_indices = @transform_4, window_bounds = array<i64: 1, 128>}, {pipeline_mode = #tpu.pipeline_mode<synchronous>, transform_indices = @transform_5, window_bounds = array<i64: 128, 128>}, {pipeline_mode = #tpu.pipeline_mode<synchronous>, transform_indices = @transform_6, window_bounds = array<i64: 1, 128>}, {transform_indices = @transform_7, window_bounds = array<i64: 8, 4>}]} {
    %c0 = arith.constant 0 : index
    %c0_0 = arith.constant 0 : index
    %0 = vector.load %arg1[%c0, %c0_0] : memref<8x8xf32, #tpu.memory_space<vmem>>, vector<8x8xf32>
    %1 = arith.truncf %0 : vector<8x8xf32> to vector<8x8xbf16>
    %c0_1 = arith.constant 0 : index
    %c0_2 = arith.constant 0 : index
    %2 = vector.load %arg2[%c0_1, %c0_2] : memref<8x128xbf16, #tpu.memory_space<vmem>>, vector<8x128xbf16>
    %cst = arith.constant dense<0.000000e+00> : vector<8x128xf32>
    %3 = tpu.matmul %1, %2, %cst {dimension_numbers = #tpu.dot_dimension_numbers<[1], [0], [0], [1], [0, 0, 1, 1], [], []>} : vector<8x8xbf16>, vector<8x128xbf16>, vector<8x128xf32> -> vector<8x128xf32>
    %c0_3 = arith.constant 0 : index
    %c0_4 = arith.constant 0 : index
    %4 = vector.load %arg3[%c0_3, %c0_4] : memref<1x128xf32, #tpu.memory_space<vmem>>, vector<1x128xf32>
    %5 = vector.broadcast %4 : vector<1x128xf32> to vector<8x128xf32>
    %6 = arith.addf %3, %5 : vector<8x128xf32>
    %cst_5 = arith.constant 0.000000e+00 : f32
    %7 = vector.broadcast %cst_5 : f32 to vector<8x128xf32>
    %8 = arith.maximumf %6, %7 : vector<8x128xf32>
    %9 = arith.truncf %8 : vector<8x128xf32> to vector<8x128xbf16>
    %c0_6 = arith.constant 0 : index
    %c0_7 = arith.constant 0 : index
    %10 = vector.load %arg4[%c0_6, %c0_7] : memref<128x128xbf16, #tpu.memory_space<vmem>>, vector<128x128xbf16>
    %cst_8 = arith.constant dense<0.000000e+00> : vector<8x128xf32>
    %11 = tpu.matmul %9, %10, %cst_8 {dimension_numbers = #tpu.dot_dimension_numbers<[1], [0], [0], [1], [0, 0, 1, 1], [], []>} : vector<8x128xbf16>, vector<128x128xbf16>, vector<8x128xf32> -> vector<8x128xf32>
    %c0_9 = arith.constant 0 : index
    %c0_10 = arith.constant 0 : index
    %12 = vector.load %arg5[%c0_9, %c0_10] : memref<1x128xf32, #tpu.memory_space<vmem>>, vector<1x128xf32>
    %13 = vector.broadcast %12 : vector<1x128xf32> to vector<8x128xf32>
    %14 = arith.addf %11, %13 : vector<8x128xf32>
    %cst_11 = arith.constant 0.000000e+00 : f32
    %15 = vector.broadcast %cst_11 : f32 to vector<8x128xf32>
    %16 = arith.maximumf %14, %15 : vector<8x128xf32>
    %17 = arith.truncf %16 : vector<8x128xf32> to vector<8x128xbf16>
    %c0_12 = arith.constant 0 : index
    %c0_13 = arith.constant 0 : index
    %18 = vector.load %arg6[%c0_12, %c0_13] : memref<128x128xbf16, #tpu.memory_space<vmem>>, vector<128x128xbf16>
    %cst_14 = arith.constant dense<0.000000e+00> : vector<8x128xf32>
    %19 = tpu.matmul %17, %18, %cst_14 {dimension_numbers = #tpu.dot_dimension_numbers<[1], [0], [0], [1], [0, 0, 1, 1], [], []>} : vector<8x128xbf16>, vector<128x128xbf16>, vector<8x128xf32> -> vector<8x128xf32>
    %c0_15 = arith.constant 0 : index
    %c0_16 = arith.constant 0 : index
    %20 = vector.load %arg7[%c0_15, %c0_16] : memref<1x128xf32, #tpu.memory_space<vmem>>, vector<1x128xf32>
    %21 = vector.broadcast %20 : vector<1x128xf32> to vector<8x128xf32>
    %22 = arith.addf %19, %21 : vector<8x128xf32>
    %23 = vector.extract_strided_slice %22 {offsets = [0, 0], sizes = [8, 4], strides = [1, 1]} : vector<8x128xf32> to vector<8x4xf32>
    %c0_17 = arith.constant 0 : index
    %c0_18 = arith.constant 0 : index
    %24 = vector.load %arg8[%c0_17, %c0_18] : memref<8x4xf32, #tpu.memory_space<vmem>>, vector<8x4xf32>
    tpu.vector_store %arg8[%c0_17, %c0_18], %23 {strides = array<i32>} : memref<8x4xf32, #tpu.memory_space<vmem>>, vector<8x4xf32>,
    return
  }
  func.func @transform_0(%arg0: i32) -> (i32, i32) {
    %c0_i32 = arith.constant 0 : i32
    %c0_i32_0 = arith.constant 0 : i32
    return %arg0, %c0_i32 : i32, i32
  }
  func.func @transform_1(%arg0: i32) -> (i32, i32) {
    %c0_i32 = arith.constant 0 : i32
    %c0_i32_0 = arith.constant 0 : i32
    %c0_i32_1 = arith.constant 0 : i32
    return %c0_i32, %c0_i32_0 : i32, i32
  }
  func.func @transform_2(%arg0: i32) -> (i32, i32) {
    %c0_i32 = arith.constant 0 : i32
    %c0_i32_0 = arith.constant 0 : i32
    %c0_i32_1 = arith.constant 0 : i32
    return %c0_i32, %c0_i32_0 : i32, i32
  }
  func.func @transform_3(%arg0: i32) -> (i32, i32) {
    %c0_i32 = arith.constant 0 : i32
    %c0_i32_0 = arith.constant 0 : i32
    %c0_i32_1 = arith.constant 0 : i32
    return %c0_i32, %c0_i32_0 : i32, i32
  }
  func.func @transform_4(%arg0: i32) -> (i32, i32) {
    %c0_i32 = arith.constant 0 : i32
    %c0_i32_0 = arith.constant 0 : i32
    %c0_i32_1 = arith.constant 0 : i32
    return %c0_i32, %c0_i32_0 : i32, i32
  }
  func.func @transform_5(%arg0: i32) -> (i32, i32) {
    %c0_i32 = arith.constant 0 : i32
    %c0_i32_0 = arith.constant 0 : i32
    %c0_i32_1 = arith.constant 0 : i32
    return %c0_i32, %c0_i32_0 : i32, i32
  }
  func.func @transform_6(%arg0: i32) -> (i32, i32) {
    %c0_i32 = arith.constant 0 : i32
    %c0_i32_0 = arith.constant 0 : i32
    %c0_i32_1 = arith.constant 0 : i32
    return %c0_i32, %c0_i32_0 : i32, i32
  }
  func.func @transform_7(%arg0: i32) -> (i32, i32) {
    %c0_i32 = arith.constant 0 : i32
    %c0_i32_0 = arith.constant 0 : i32
    return %arg0, %c0_i32 : i32, i32
  }
}

</mosaic_0001>

<bundles_post_ra>
// kernel: tpu_custom_call.1
= control target key start
LH: loop header
LB: loop body
LE: loop exit
PB: predicated region body
PF: predicated region fallthrough
CT: control target
= control target key end

     0   :  { %12 = vsyncpa [#allocation3], 0  ;;  %s551_s0 = inlined_call_operand.hbm [shape: f32[8,8], index: 0, kind: input, shape index: {}]   ;;  %s552_s1 = inlined_call_operand.hbm [shape: bf16[8,128], index: 1, kind: input, shape index: {}]   ;;  %s553_s2 = inlined_call_operand.vmem [shape: f32[1,128], index: 2, kind: input, shape index: {}]   ;;  %s554_s3 = inlined_call_operand.hbm [shape: bf16[128,128], index: 3, kind: input, shape index: {}]   ;;  %s555_s4 = inlined_call_operand.vmem [shape: f32[1,128], index: 4, kind: input, shape index: {}]   ;;  %s556_s5 = inlined_call_operand.hbm [shape: bf16[128,128], index: 5, kind: input, shape index: {}]   ;;  %s557_s6 = inlined_call_operand.vmem [shape: f32[1,128], index: 6, kind: input, shape index: {}]   ;;  %s558_s7 = inlined_call_operand.vmem [shape: f32[8,4], index: 7, kind: output, shape index: {}]  }
   0x1   :  { %13 = vsyncpa [#allocation5], 0  ;;  %s31_s26 = sshll.u32 %s552_s1, 4  ;;  %s32_s26 = int_to_ptr.hbm [resolvable:$true] %s31_s26 }
   0x2   :  { %14 = vsyncpa [#allocation8], 0  ;;  %s481_s27 = smov [#allocation4]   ;;  %s20_s8 = sshll.u32 %s551_s0, 4  ;;  %s21_s8 = int_to_ptr.hbm [resolvable:$true] %s20_s8 }
   0x3   :  { %s33_s28 = sshll.u32 %s481_s27, 4  ;;  %s482_s9 = smov [#allocation2]   ;;  %s34_s28 = int_to_ptr.vmem [resolvable:$true] %s33_s28 }
   0x4   :  { %36 = dma.hbm_to_vmem [thread:$0]  %s32_s26, 64, %s34_s28, [#allocation5]  }
   0x5   :  { %s22_s10 = sshll.u32 %s482_s9, 4  ;;  %s43_s13 = sshll.u32 %s554_s3, 4  ;;  %s23_s10 = int_to_ptr.vmem [resolvable:$true] %s22_s10  ;;  %s44_s13 = int_to_ptr.hbm [resolvable:$true] %s43_s13 }
   0x6   :  { %25 = dma.hbm_to_vmem [thread:$0]  %s21_s8, 128, %s23_s10, [#allocation3]  }
   0x7   :  { %s483_s1 = smov [#allocation6]   ;;  %s58_s17 = sshll.u32 %s556_s5, 4  ;;  %s59_s17 = int_to_ptr.hbm [resolvable:$true] %s58_s17 }
   0x8   :  { %s45_s14 = sshll.u32 %s483_s1, 4  ;;  %s484_s18 = smov 64   ;;  %s46_s14 = int_to_ptr.vmem [resolvable:$true] %s45_s14 }
   0x9   :  { %s485_s0 = smov 4   ;;  %s486_s19 = smov [#allocation7]  }
   0xa   :  { %51 = dma.hbm_to_vmem [thread:$0]  %s44_s13, 1024, %s46_s14, [#allocation5], %s484_s18, %s484_s18, %s485_s0  }
   0xb   :  { %s60_s20 = sshll.u32 %s486_s19, 4  ;;  %s61_s20 = int_to_ptr.vmem [resolvable:$true] %s60_s20 }
   0xc   :  { %66 = dma.hbm_to_vmem [thread:$0]  %s59_s17, 1024, %s61_s20, [#allocation8], %s484_s18, %s484_s18, %s485_s0  }
   0xd   :  { %475 = dma.done.wait [#allocation3], 128  }
   0xe   :  { %476 = vsyncadd [#allocation3], 4294967168 }
   0xf   :  { %477 = dma.done.wait [#allocation5], 1088  }
  0x10   :  { %478 = vsyncadd [#allocation5], 4294966208 }
  0x11   :  { %479 = dma.done.wait [#allocation8], 1024  }
  0x12   :  { %480 = vsyncadd [#allocation8], 4294966272  ;;  %vm97_vm0 = vcmask 1043456   ;;  %v88_v0 = vld [vmem:[#allocation4] sm:$0xf]  ;;  %v86_v1 = vld [vmem:[#allocation2] sm:$0xff] }
  0x13   :  { %v361_v2 = vld [vmem:[#allocation6 + $0x38] sm:$0xff]  ;;  %v99_v3 = vsel %vm97_vm0, %v88_v0, 0  ;;  %v87_v4 = vpack.c.bf16 %v86_v1, %v86_v1  ;;  %vm93_vm1 = vcmask 64512   ;;  %v360_v5 = vld [vmem:[#allocation6 + $0x30] sm:$0xff]  ;;  %v359_v6 = vld [vmem:[#allocation6 + $0x28] sm:$0xff]  ;;  %vm280_vm2 = vcmask 31744  }
  0x14   :  { %108 = vmatpush.bf16.msra.mxu0 %v99_v3  ;;  %184 = vmatpush.bf16.msra.mxu1 %v361_v2  ;;  %v358_v7 = vld [vmem:[#allocation6 + $0x20] sm:$0xff]  ;;  %v357_v8 = vld [vmem:[#allocation6 + $0x18] sm:$0xff]  ;;  %v356_v9 = vld [vmem:[#allocation6 + $0x10] sm:$0xff] }
  0x15   :  { %v355_v10 = vld [vmem:[#allocation6 + $0x8] sm:$0xff]  ;;  %v354_v11 = vld [vmem:[#allocation6] sm:$0xff]  ;;  %v369_v12 = vld [vmem:[#allocation7 + $0x38] sm:$0xff] }
  0x16   :  { %267 = vmatpush.bf16.msra.mxu2 %v369_v12  ;;  %v368_v13 = vld [vmem:[#allocation7 + $0x30] sm:$0xff]  ;;  %v367_v14 = vld [vmem:[#allocation7 + $0x28] sm:$0xff]  ;;  %v366_v15 = vld [vmem:[#allocation7 + $0x20] sm:$0xff] }
  0x17   :  { %289 = vmatmul.msk.bf16.vlgmr.msra.gmra.mxu0 %vm93_vm1, %v87_v4  ;;  %v365_v16 = vld [vmem:[#allocation7 + $0x18] sm:$0xff]  ;;  %v364_v17 = vld [vmem:[#allocation7 + $0x10] sm:$0xff]  ;;  %v363_v24 = vld [vmem:[#allocation7 + $0x8] sm:$0xff] }
  0x18   :  { %185 = vmatpush.bf16.msra.mxu1 %v360_v5  ;;  %v376_v18 = vld [vmem:[%s553_s2] ss:$0 sm:$0xff]  ;;  %v362_v25 = vld [vmem:[#allocation7] sm:$0xff] }
  0x19   :  { %v377_v26 = vld [vmem:[%s555_s4] ss:$0 sm:$0xff] }
  0x1a   :  { %268 = vmatpush.bf16.msra.mxu2 %v368_v13  ;;  %v378_v32 = vld [vmem:[%s557_s6] ss:$0 sm:$0xff] }
  0x1c   :  { %186 = vmatpush.bf16.msra.mxu1 %v359_v6 }
  0x1e   :  { %269 = vmatpush.bf16.msra.mxu2 %v367_v14 }
  0x20   :  { %187 = vmatpush.bf16.msra.mxu1 %v358_v7 }
  0x22   :  { %270 = vmatpush.bf16.msra.mxu2 %v366_v15 }
  0x24   :  { %188 = vmatpush.bf16.msra.mxu1 %v357_v8 }
  0x26   :  { %271 = vmatpush.bf16.msra.mxu2 %v365_v16 }
  0x28   :  { %189 = vmatpush.bf16.msra.mxu1 %v356_v9 }
  0x2a   :  { %272 = vmatpush.bf16.msra.mxu2 %v364_v17 }
  0x2c   :  { %190 = vmatpush.bf16.msra.mxu1 %v355_v10 }
  0x2e   :  { %273 = vmatpush.bf16.msra.mxu2 %v363_v24 }
  0x30   :  { %191 = vmatpush.bf16.msra.mxu1 %v354_v11 }
  0x32   :  { %274 = vmatpush.bf16.msra.mxu2 %v362_v25 }
  0x94   :  { %v110_v19 = vpop.f32.mrf.mxu0 }
  0x95   :  { %v111_v20 = vadd.f32 %v376_v18, %v110_v19 }
  0x97   :  { %v114_v21 = vmax.f32 %v111_v20, 0.0 }
  0x99   :  { %v115_v22 = vpack.c.bf16 %v114_v21, %v114_v21 }
  0x9b   :  { %192 = vmatmul.bf16.vlgmr.msra.gmra.mxu1 %v115_v22 }
  0x9c   :  { %v112_v23 = vpop.f32.mrf.mxu0 }
 0x118   :  { %v193_v27 = vpop.f32.mrf.mxu1 }
 0x119   :  { %v194_v28 = vadd.f32 %v377_v26, %v193_v27 }
 0x11b   :  { %v197_v29 = vmax.f32 %v194_v28, 0.0 }
 0x11d   :  { %v198_v30 = vpack.c.bf16 %v197_v29, %v197_v29 }
 0x11f   :  { %275 = vmatmul.bf16.vlgmr.msra.gmra.mxu2 %v198_v30 }
 0x120   :  { %v195_v31 = vpop.f32.mrf.mxu1 }
 0x1a2   :  { %v276_v33 = vpop.f32.mrf.mxu2 }
 0x1a3   :  { %v277_v34 = vadd.f32 %v378_v32, %v276_v33 }
 0x1a5   :  { %281 = vst.msk [vmem:[%s558_s7] sm:$0xff] %vm280_vm2, %v277_v34 }
 0x1aa   :  { %v278_v35 = vpop.f32.mrf.mxu2 }
 0x1ab   :  { %286 = vsyncpa [#allocation3], 1 }
 0x1ac   :  { %287 = vsyncpa [#allocation5], 1 }
 0x1ad   :  { %288 = vsyncpa [#allocation8], 1 }

</bundles_post_ra>
